<compile_context>
chip_gen: v7x
topology: tpu7x:2x2x1
jax: 0.10.0
libtpu: 0.0.40
codegen_flags: <defaults>
</compile_context>

<pallas_src>
import functools

import jax
import jax.numpy as jnp
from jax import lax
from jax.experimental import pallas as pl
from jax.experimental.pallas import tpu as pltpu


def _round_up(n, m):
    return ((n + m - 1) // m) * m


# ---------------------------------------------------------------------------
# Shared kernel pieces
# ---------------------------------------------------------------------------
def _heads(x_ref, w1_ref, b1_ref, w23_ref, b23_ref):
    """f = relu(x @ W1 + b1); AV = f @ W23 + b23 (W23 = [W2 | W3 | 0-pad], lane-dense).

    Matmuls may take bf16 operands but ALWAYS accumulate in f32.
    NOTE: the biases b1/b23 must stay f32 — they are added to the f32 accumulator.
    Casting them to bf16 in a future refactor would silently change results.
    """
    x = x_ref[...]
    f = jnp.dot(x, w1_ref[...], preferred_element_type=jnp.float32) + b1_ref[...]
    f = jnp.maximum(f, 0.0)                                            # (TB, F) f32
    av = jnp.dot(f.astype(w23_ref.dtype), w23_ref[...],
                 preferred_element_type=jnp.float32) + b23_ref[...]
    return av                                                           # (TB, Npad) f32


def _masked_probs_dot_a(av, row0, batch, action_dim):
    """sum over valid rows/cols of softmax(A)*A for one (TB, Npad) slab + the col mask."""
    tb, npad = av.shape
    col = lax.broadcasted_iota(jnp.int32, (1, npad), 1)
    col_valid = col < action_dim                                # real A columns only
    row = lax.broadcasted_iota(jnp.int32, (tb, 1), 0) + row0
    row_valid = row < batch                                     # real batch rows only

    m = jnp.max(jnp.where(col_valid, av, -jnp.inf), axis=1, keepdims=True)
    e = jnp.where(col_valid, jnp.exp(av - m), 0.0)
    denom = jnp.sum(e, axis=1, keepdims=True)
    # EXACT division: this feeds the batch-global scalar, where approximate
    # reciprocal error accumulates O(B) (accuracy bug flagged in review).
    probs = e / denom
    partial = jnp.sum(jnp.where(row_valid, probs * av, 0.0))
    return partial, col_valid


# ---------------------------------------------------------------------------
# Fast path: whole (padded) batch resident in VMEM, single launch.
# ---------------------------------------------------------------------------
def _fused_kernel(x_ref, w1_ref, b1_ref, w23_ref, b23_ref, q_ref, *, batch, action_dim):
    av = _heads(x_ref, w1_ref, b1_ref, w23_ref, b23_ref)        # (Bp, Npad) f32
    s, col_valid = _masked_probs_dot_a(av, 0, batch, action_dim)
    v = av[:, action_dim:action_dim + 1]                        # fused V column, (Bp, 1)
    q_ref[...] = jnp.where(col_valid, av - s + v, 0.0).astype(q_ref.dtype)


# ---------------------------------------------------------------------------
# Tiled fallback (very large batches): pass 1 = per-tile partial sums (parallel),
# pass 2 = apply the global scalar (parallel).
# ---------------------------------------------------------------------------
def _partial_sum_kernel(x_ref, w1_ref, b1_ref, w23_ref, b23_ref, ps_ref, *, batch, action_dim):
    av = _heads(x_ref, w1_ref, b1_ref, w23_ref, b23_ref)        # (TB, Npad)
    row0 = pl.program_id(0) * av.shape[0]
    partial, _ = _masked_probs_dot_a(av, row0, batch, action_dim)
    # Per-tile partial sum -> distinct output block per grid index, so the grid axis is
    # "parallel" (v7x megacore) and there is no SMEM read-modify-write serialization.
    ps_ref[...] = jnp.full(ps_ref.shape, partial, jnp.float32)


def _apply_kernel(x_ref, w1_ref, b1_ref, w23_ref, b23_ref, s_ref, q_ref, *, action_dim):
    av = _heads(x_ref, w1_ref, b1_ref, w23_ref, b23_ref)        # (TB, Npad)
    _, npad = av.shape
    col = lax.broadcasted_iota(jnp.int32, (1, npad), 1)
    col_valid = col < action_dim
    v = av[:, action_dim:action_dim + 1]
    s = s_ref[0, 0]
    q_ref[...] = jnp.where(col_valid, av - s + v, 0.0).astype(q_ref.dtype)


# ---------------------------------------------------------------------------
# Wrapper
# ---------------------------------------------------------------------------
_FAST_PATH_BYTES = 18 * 1024 * 1024      # VMEM-resident working-set budget (fits v7x 64 MiB)


def net_forward(x, w1, b1, w2, b2, w3, b3, *, block_b=2048, use_bf16=True,
                out_dtype=jnp.float32, force_tiled=False):
    """x: (B, obs). Weights are (in, out); biases (1, out). Returns (B, Adim) in out_dtype.

    use_bf16: bf16 MXU operands (x/W1/W23) with f32 accumulation — the native MXU path on
      v5e/v6e/v7x and half the x DMA bytes.  Set False for a bit-tighter f32 result.
    out_dtype: pass jnp.bfloat16 to halve the dominant Q writeback stream if the consumer allows.
    """
    B, obs_dim = x.shape
    feat_dim = w1.shape[1]
    action_dim = w2.shape[1]

    # Fuse the V head into the A head; pad head width to a lane-dense multiple of 128.
    n_pad = _round_up(action_dim + 1, 128)
    w23 = jnp.zeros((feat_dim, n_pad), jnp.float32)
    w23 = w23.at[:, :action_dim].set(w2).at[:, action_dim].set(w3[:, 0])
    b23 = jnp.zeros((1, n_pad), jnp.float32)
    b23 = b23.at[:, :action_dim].set(b2).at[:, action_dim].set(b3[:, 0])

    in_dtype = jnp.bfloat16 if use_bf16 else jnp.float32
    w1_c = w1.astype(in_dtype)
    w23_c = w23.astype(in_dtype)
    # Biases intentionally kept f32 (added to the f32 accumulator inside the kernel).
    b1_c = b1.astype(jnp.float32)
    b23_c = b23.astype(jnp.float32)

    in_sz = jnp.dtype(in_dtype).itemsize
    out_sz = jnp.dtype(out_dtype).itemsize
    w_bytes = w1_c.size * in_sz + w23_c.size * in_sz + (b1_c.size + b23_c.size) * 4
    flops = 2 * B * (obs_dim * feat_dim + feat_dim * n_pad)

    vmem = pltpu.MemorySpace.VMEM
    smem = pltpu.MemorySpace.SMEM

    # ---------------- Fast path: single launch, whole padded batch in VMEM. ----------------
    b_fast = _round_up(B, 8)
    # Rough per-row working set: x (2x buffered) + f + ~4 f32 slabs of width n_pad + q (2x).
    est_bytes = (b_fast * (2 * obs_dim * in_sz + 4 * feat_dim + 16 * n_pad + 2 * out_sz * n_pad)
                 + w_bytes)
    if not force_tiled and est_bytes <= _FAST_PATH_BYTES:
        x_p = jnp.pad(x, ((0, b_fast - B), (0, 0))).astype(in_dtype)
        q_pad = pl.pallas_call(
            functools.partial(_fused_kernel, batch=B, action_dim=action_dim),
            in_specs=[pl.BlockSpec(memory_space=vmem)] * 5,
            out_specs=pl.BlockSpec(memory_space=vmem),
            out_shape=jax.ShapeDtypeStruct((b_fast, n_pad), out_dtype),
            compiler_params=pltpu.CompilerParams(vmem_limit_bytes=48 * 1024 * 1024),
            cost_estimate=pl.CostEstimate(
                flops=flops, transcendentals=B * n_pad,
                bytes_accessed=x_p.size * in_sz + w_bytes + b_fast * n_pad * out_sz),
        )(x_p, w1_c, b1_c, w23_c, b23_c)
        # TODO(synk): ideally the consumer fuses this slice instead of re-reading the slab.
        return q_pad[:B, :action_dim]

    # ---------------- Tiled fallback: batches too large to keep VMEM-resident. ----------------
    tb = _round_up(min(block_b, b_fast), 8)
    b_pad = _round_up(B, tb)
    num_tiles = b_pad // tb
    x_p = jnp.pad(x, ((0, b_pad - B), (0, 0))).astype(in_dtype)

    x_spec = pl.BlockSpec((tb, obs_dim), lambda i: (i, 0), memory_space=vmem)
    w1_spec = pl.BlockSpec((obs_dim, feat_dim), lambda i: (0, 0), memory_space=vmem)
    b1_spec = pl.BlockSpec((1, feat_dim), lambda i: (0, 0), memory_space=vmem)
    w23_spec = pl.BlockSpec((feat_dim, n_pad), lambda i: (0, 0), memory_space=vmem)
    b23_spec = pl.BlockSpec((1, n_pad), lambda i: (0, 0), memory_space=vmem)
    vmem_limit = 32 * 1024 * 1024   # tb=2048 working set ~2.5-3 MiB double-buffered

    # Pass 1: per-tile partial sums (embarrassingly parallel -> v7x megacore split).
    partials = pl.pallas_call(
        functools.partial(_partial_sum_kernel, batch=B, action_dim=action_dim),
        grid=(num_tiles,),
        in_specs=[x_spec, w1_spec, b1_spec, w23_spec, b23_spec],
        out_specs=pl.BlockSpec((1, 8, 128), lambda i: (i, 0, 0), memory_space=vmem),
        out_shape=jax.ShapeDtypeStruct((num_tiles, 8, 128), jnp.float32),
        compiler_params=pltpu.CompilerParams(
            dimension_semantics=("parallel",), vmem_limit_bytes=vmem_limit),
        cost_estimate=pl.CostEstimate(
            flops=flops, transcendentals=B * n_pad,
            bytes_accessed=x_p.size * in_sz + w_bytes + num_tiles * 8 * 128 * 4),
    )(x_p, w1_c, b1_c, w23_c, b23_c)

    # Tiny (num_tiles,) reduction of the tile partials; exact f32 sum.
    s = jnp.sum(partials[:, 0, 0]).reshape(1, 1)

    # Pass 2: Q = A - s + V; tiles independent -> parallel; lane-dense (tb, 128) stores.
    q_pad = pl.pallas_call(
        functools.partial(_apply_kernel, action_dim=action_dim),
        grid=(num_tiles,),
        in_specs=[x_spec, w1_spec, b1_spec, w23_spec, b23_spec,
                  pl.BlockSpec(memory_space=smem)],
        out_specs=pl.BlockSpec((tb, n_pad), lambda i: (i, 0), memory_space=vmem),
        out_shape=jax.ShapeDtypeStruct((b_pad, n_pad), out_dtype),
        compiler_params=pltpu.CompilerParams(
            dimension_semantics=("parallel",), vmem_limit_bytes=vmem_limit),
        cost_estimate=pl.CostEstimate(
            flops=flops, transcendentals=0,
            bytes_accessed=x_p.size * in_sz + w_bytes + b_pad * n_pad * out_sz),
    )(x_p, w1_c, b1_c, w23_c, b23_c, s)

    return q_pad[:B, :action_dim]


# ---------------------------------------------------------------------------
# Params / reference
# ---------------------------------------------------------------------------
def init_params(key, obs_dim, feature_dim, action_dim):
    """PyTorch-style uniform(+-1/sqrt(fan_in)) init; weights stored (in, out)."""
    ks = jax.random.split(key, 6)

    def lin(kw, kb, fan_in, fan_out):
        bound = 1.0 / jnp.sqrt(fan_in)
        w = jax.random.uniform(kw, (fan_in, fan_out), jnp.float32, -bound, bound)
        b = jax.random.uniform(kb, (1, fan_out), jnp.float32, -bound, bound)
        return w, b

    w1, b1 = lin(ks[0], ks[1], obs_dim, feature_dim)
    w2, b2 = lin(ks[2], ks[3], feature_dim, action_dim)
    w3, b3 = lin(ks[4], ks[5], feature_dim, 1)
    return w1, b1, w2, b2, w3, b3


def reference_forward(x, w1, b1, w2, b2, w3, b3, operand_dtype=jnp.float32):
    """Plain-JAX reference mirroring the PyTorch module.

    operand_dtype lets the test build a reference with the same operand quantization as
    the bf16 kernel path (f32 accumulation either way), so that path can be checked tightly.
    """
    c = lambda a: a.astype(operand_dtype)
    f = jnp.dot(c(x), c(w1), preferred_element_type=jnp.float32) + b1
    f = jnp.maximum(f, 0.0)
    fc = c(f)
    A = jnp.dot(fc, c(w2), preferred_element_type=jnp.float32) + b2
    V = jnp.dot(fc, c(w3), preferred_element_type=jnp.float32) + b3
    probs = jax.nn.softmax(A, axis=1)
    A = A - jnp.sum(probs * A)
    return A + V


if __name__ == "__main__":
    # Small shapes consistent with the module: obs_dim from env.observation_space,
    # action_dim from env.action_space, feature_dim from args.
    batch, obs_dim, feature_dim, action_dim = 50, 16, 32, 4

    key = jax.random.PRNGKey(0)
    k_x, k_p = jax.random.split(key)
    x = jax.random.normal(k_x, (batch, obs_dim), jnp.float32)
    params = init_params(k_p, obs_dim, feature_dim, action_dim)

    q_ref_f32 = reference_forward(x, *params)
    q_ref_bf16 = reference_forward(x, *params, operand_dtype=jnp.bfloat16)

    # 1) Fast path (single launch), f32 operands + exact softmax division.
    #    Tolerance covers only the TPU default matmul-precision difference between the
    #    XLA reference and the in-kernel MXU dots; the softmax scalar is now exact and
    #    the error no longer grows with batch size.
    q_f32 = jax.block_until_ready(net_forward(x, *params, use_bf16=False))
    assert q_f32.shape == (batch, action_dim)
    assert jnp.allclose(q_f32, q_ref_f32, atol=2e-2, rtol=2e-2), "f32 fast path mismatch"

    # 2) Fast path with default bf16 MXU operands (f32 accumulation), checked TIGHTLY
    #    against a reference using the identical operand quantization.
    q_bf16 = jax.block_until_ready(net_forward(x, *params))
    assert jnp.allclose(q_bf16, q_ref_bf16, atol=2e-3, rtol=2e-3), "bf16 fast path mismatch"

    # 3) Forced tiled fallback (multi-tile parallel partial sums + apply pass), f32 operands.
    q_tiled = jax.block_until_ready(
        net_forward(x, *params, use_bf16=False, force_tiled=True, block_b=16))
    assert q_tiled.shape == (batch, action_dim)
    assert jnp.allclose(q_tiled, q_ref_f32, atol=2e-2, rtol=2e-2), "tiled path mismatch"
    assert jnp.allclose(q_tiled, q_f32, atol=1e-4, rtol=1e-4), "tiled vs fast path mismatch"

    print("KERNEL_OK")
</pallas_src>

<mosaic_0001>
module attributes {stable_mosaic.version = 11 : i64} {
  func.func @_fused_kernel(%arg0: memref<56x16xf32, #tpu.memory_space<vmem>>, %arg1: memref<16x32xf32, #tpu.memory_space<vmem>>, %arg2: memref<1x32xf32, #tpu.memory_space<vmem>>, %arg3: memref<32x128xf32, #tpu.memory_space<vmem>>, %arg4: memref<1x128xf32, #tpu.memory_space<vmem>>, %arg5: memref<56x128xf32, #tpu.memory_space<vmem>>) attributes {dimension_semantics = [], scalar_prefetch = 0 : i64, scratch_operands = 0 : i64, tpu.core_type = #tpu.core_type<tc>} {
    %c0 = arith.constant 0 : index
    %c0_0 = arith.constant 0 : index
    %0 = vector.load %arg0[%c0, %c0_0] : memref<56x16xf32, #tpu.memory_space<vmem>>, vector<56x16xf32>
    %c0_1 = arith.constant 0 : index
    %c0_2 = arith.constant 0 : index
    %1 = vector.load %arg1[%c0_1, %c0_2] : memref<16x32xf32, #tpu.memory_space<vmem>>, vector<16x32xf32>
    %cst = arith.constant dense<0.000000e+00> : vector<56x32xf32>
    %2 = tpu.matmul %0, %1, %cst {dimension_numbers = #tpu.dot_dimension_numbers<[1], [0], [0], [1], [0, 0, 1, 1], [], []>} : vector<56x16xf32>, vector<16x32xf32>, vector<56x32xf32> -> vector<56x32xf32>
    %c0_3 = arith.constant 0 : index
    %c0_4 = arith.constant 0 : index
    %3 = vector.load %arg2[%c0_3, %c0_4] : memref<1x32xf32, #tpu.memory_space<vmem>>, vector<1x32xf32>
    %4 = vector.broadcast %3 : vector<1x32xf32> to vector<56x32xf32>
    %5 = arith.addf %2, %4 : vector<56x32xf32>
    %cst_5 = arith.constant 0.000000e+00 : f32
    %6 = vector.broadcast %cst_5 : f32 to vector<56x32xf32>
    %7 = arith.maximumf %5, %6 : vector<56x32xf32>
    %c0_6 = arith.constant 0 : index
    %c0_7 = arith.constant 0 : index
    %8 = vector.load %arg3[%c0_6, %c0_7] : memref<32x128xf32, #tpu.memory_space<vmem>>, vector<32x128xf32>
    %cst_8 = arith.constant dense<0.000000e+00> : vector<56x128xf32>
    %9 = tpu.matmul %7, %8, %cst_8 {dimension_numbers = #tpu.dot_dimension_numbers<[1], [0], [0], [1], [0, 0, 1, 1], [], []>} : vector<56x32xf32>, vector<32x128xf32>, vector<56x128xf32> -> vector<56x128xf32>
    %c0_9 = arith.constant 0 : index
    %c0_10 = arith.constant 0 : index
    %10 = vector.load %arg4[%c0_9, %c0_10] : memref<1x128xf32, #tpu.memory_space<vmem>>, vector<1x128xf32>
    %11 = vector.broadcast %10 : vector<1x128xf32> to vector<56x128xf32>
    %12 = arith.addf %9, %11 : vector<56x128xf32>
    %13 = tpu.iota {dimensions = array<i32: 1>} : vector<1x128xi32>
    %c4_i32 = arith.constant 4 : i32
    %14 = vector.broadcast %c4_i32 : i32 to vector<1x128xi32>
    %15 = arith.cmpi slt, %13, %14 : vector<1x128xi32>
    %16 = tpu.iota {dimensions = array<i32: 0>} : vector<56x1xi32>
    %c0_i32 = arith.constant 0 : i32
    %17 = vector.broadcast %c0_i32 : i32 to vector<56x1xi32>
    %18 = arith.addi %16, %17 : vector<56x1xi32>
    %c50_i32 = arith.constant 50 : i32
    %19 = vector.broadcast %c50_i32 : i32 to vector<56x1xi32>
    %20 = arith.cmpi slt, %18, %19 : vector<56x1xi32>
    %cst_11 = arith.constant 0xFF800000 : f32
    %21 = vector.shape_cast %15 : vector<1x128xi1> to vector<1x128xi1>
    %22 = vector.broadcast %21 : vector<1x128xi1> to vector<56x128xi1>
    %23 = vector.broadcast %cst_11 : f32 to vector<56x128xf32>
    %24 = arith.select %22, %12, %23 : vector<56x128xi1>, vector<56x128xf32>
    %cst_12 = arith.constant dense<0xFF800000> : vector<56xf32>
    %25 = vector.multi_reduction <maximumf>, %24, %cst_12 [1] : vector<56x128xf32> to vector<56xf32>
    %26 = vector.shape_cast %25 : vector<56xf32> to vector<56x1xf32>
    %27 = vector.broadcast %26 : vector<56x1xf32> to vector<56x128xf32>
    %28 = arith.subf %12, %27 : vector<56x128xf32>
    %29 = math.exp %28 : vector<56x128xf32>
    %cst_13 = arith.constant 0.000000e+00 : f32
    %30 = vector.shape_cast %15 : vector<1x128xi1> to vector<1x128xi1>
    %31 = vector.broadcast %30 : vector<1x128xi1> to vector<56x128xi1>
    %32 = vector.broadcast %cst_13 : f32 to vector<56x128xf32>
    %33 = arith.select %31, %29, %32 : vector<56x128xi1>, vector<56x128xf32>
    %cst_14 = arith.constant dense<0.000000e+00> : vector<56xf32>
    %34 = vector.multi_reduction <add>, %33, %cst_14 [1] : vector<56x128xf32> to vector<56xf32>
    %35 = vector.shape_cast %34 : vector<56xf32> to vector<56x1xf32>
    %36 = vector.broadcast %35 : vector<56x1xf32> to vector<56x128xf32>
    %37 = arith.divf %33, %36 : vector<56x128xf32>
    %38 = arith.mulf %37, %12 : vector<56x128xf32>
    %cst_15 = arith.constant 0.000000e+00 : f32
    %39 = vector.shape_cast %20 : vector<56x1xi1> to vector<56x1xi1>
    %40 = vector.broadcast %39 : vector<56x1xi1> to vector<56x128xi1>
    %41 = vector.broadcast %cst_15 : f32 to vector<56x128xf32>
    %42 = arith.select %40, %38, %41 : vector<56x128xi1>, vector<56x128xf32>
    %43 = vector.shape_cast %42 : vector<56x128xf32> to vector<1x56x128xf32>
    %cst_16 = arith.constant dense<0.000000e+00> : vector<1xf32>
    %44 = vector.multi_reduction <add>, %43, %cst_16 [1, 2] : vector<1x56x128xf32> to vector<1xf32>
    %45 = vector.shape_cast %44 : vector<1xf32> to vector<1x1x1xf32>
    %46 = vector.extract %45[0, 0, 0] : f32 from vector<1x1x1xf32>
    %47 = vector.extract_strided_slice %12 {offsets = [0, 4], sizes = [56, 1], strides = [1, 1]} : vector<56x128xf32> to vector<56x1xf32>
    %48 = vector.broadcast %46 : f32 to vector<56x128xf32>
    %49 = arith.subf %12, %48 : vector<56x128xf32>
    %50 = vector.broadcast %47 : vector<56x1xf32> to vector<56x128xf32>
    %51 = arith.addf %49, %50 : vector<56x128xf32>
    %cst_17 = arith.constant 0.000000e+00 : f32
    %52 = vector.shape_cast %15 : vector<1x128xi1> to vector<1x128xi1>
    %53 = vector.broadcast %52 : vector<1x128xi1> to vector<56x128xi1>
    %54 = vector.broadcast %cst_17 : f32 to vector<56x128xf32>
    %55 = arith.select %53, %51, %54 : vector<56x128xi1>, vector<56x128xf32>
    %c0_18 = arith.constant 0 : index
    %c0_19 = arith.constant 0 : index
    %56 = vector.load %arg5[%c0_18, %c0_19] : memref<56x128xf32, #tpu.memory_space<vmem>>, vector<56x128xf32>
    tpu.vector_store %arg5[%c0_18, %c0_19], %55 {strides = array<i32>} : memref<56x128xf32, #tpu.memory_space<vmem>>, vector<56x128xf32>,
    return
  }
}

</mosaic_0001>

<bundles_post_ra>
// kernel: tpu_custom_call.1
= control target key start
LH: loop header
LB: loop body
LE: loop exit
PB: predicated region body
PF: predicated region fallthrough
CT: control target
= control target key end

     0   :  { %v681_v2 = vmov 0.0|0.0   ;;  %vm682_vm0 = vmmov 0   ;;  %v683_v4 = vmov 0.0   ;;  %vm37_vm1 = vcmask 130048   ;;  %s920_s0 = inlined_call_operand.vmem [shape: f32[56,16], index: 0, kind: input, shape index: {}]   ;;  %s921_s1 = inlined_call_operand.vmem [shape: f32[16,32], index: 1, kind: input, shape index: {}]   ;;  %s922_s2 = inlined_call_operand.vmem [shape: f32[1,32], index: 2, kind: input, shape index: {}]   ;;  %s923_s3 = inlined_call_operand.vmem [shape: f32[32,128], index: 3, kind: input, shape index: {}]   ;;  %s924_s4 = inlined_call_operand.vmem [shape: f32[1,128], index: 4, kind: input, shape index: {}]   ;;  %s925_s5 = inlined_call_operand.hbm [shape: f32[56,128], index: 5, kind: output, shape index: {}]  }
   0x1   :  { %v28_v0 = vld [vmem:[%s921_s1] sm:$0xff]  ;;  %v29_v1 = vld [vmem:[%s921_s1 + $0x8] sm:$0xff]  ;;  %609 = vmatprep.subr.bf16.mxu0 %v681_v2  ;;  %559 = vmatprep.mubr.msk.f32.mxu0 %vm682_vm0, %v683_v4 }
   0x2   :  { %v610_v3 = vpack.c.bf16 %v29_v1, %v28_v0  ;;  %612 = vmatprep.subr.bf16.mxu1 %v681_v2  ;;  %588 = vmatprep.mubr.msk.f32.mxu1 %vm682_vm0, %v683_v4  ;;  %v21_v5 = vld [vmem:[%s920_s0] sm:$0xff]  ;;  %v167_v7 = vld [vmem:[%s923_s3 + $0x8] sm:$0xff] }
   0x3   :  { %v166_v6 = vld [vmem:[%s923_s3] sm:$0xff] }
   0x4   :  { %611 = vmatpush3.bf16.msra.mxu0 %v610_v3  ;;  %v613_v8 = vpack.c.bf16 %v167_v7, %v166_v6 }
   0x5   :  { %10 = vsyncpa [#allocation3], 0  ;;  %v22_v9 = vld [vmem:[%s920_s0 + $0x8] sm:$0xff]  ;;  %v23_v10 = vld [vmem:[%s920_s0 + $0x10] sm:$0xff]  ;;  %vm177_vm2 = vcmask 261120   ;;  %v299_v47 = vlaneseq }
   0x6   :  { %614 = vmatpush3.bf16.msra.mxu1 %v613_v8  ;;  %v24_v11 = vld [vmem:[%s920_s0 + $0x18] sm:$0xff]  ;;  %v25_v12 = vld [vmem:[%s920_s0 + $0x20] sm:$0xff]  ;;  %v26_v13 = vld [vmem:[%s920_s0 + $0x28] sm:$0xff] }
   0x7   :  { %560 = vmatmul.mubr.msk.f32.vlgmr.msra.gmra.mrb[0].mxu0 %vm37_vm1, %v21_v5  ;;  %615 = vmatprep.subr.bf16.mxu1 %v681_v2  ;;  %v27_v14 = vld [vmem:[%s920_s0 + $0x30] sm:$0xff]  ;;  %v169_v16 = vld [vmem:[%s923_s3 + $0x18] sm:$0xff]  ;;  %v519_v18 = vld [vmem:[%s922_s2] ss:$0 sm:$0xff]  ;;  %v803_v48 = vand.u32 127, %v299_v47 }
   0x8   :  { %562 = vmatprep.mubr.msk.f32.mxu0 %vm682_vm0, %v683_v4  ;;  %v168_v15 = vld [vmem:[%s923_s3 + $0x10] sm:$0xff]  ;;  %v527_v49 = vld [vmem:[%s924_s4] ss:$0 sm:$0xff]  ;;  %s685_s4 = smov [#allocation2]  }
   0x9   :  { %v616_v17 = vpack.c.bf16 %v169_v16, %v168_v15  ;;  %vm301_vm3 = vcmp.lt.s32.totalorder %v803_v48, 4  ;;  %s508_s20 = sshll.u32 %s685_s4, 4  ;;  %s887_s20 = int_to_ptr.vmem [resolvable:$true] %s508_s20 }
   0xa   :  { %s657_s21 = scalar_lea.vmem %s887_s20, 896  ;;  %p662_p1 = scmp.lt.s32.totalorder %s887_s20, %s887_s20 }
   0xb   :  { %563 = vmatmul.mubr.msk.f32.gmra.mrb[2].mxu0 %vm37_vm1, %v22_v9  ;;  %617 = vmatpush3.bf16.msra.mxu1 %v616_v17  ;;  %p658_p0 = scmp.ne.s32.totalorder %s887_s20, %s657_s21  ;;  %p663_p2 = scmp.lt.s32.totalorder %s657_s21, %s657_s21 }
   0xc   :  { %565 = vmatprep.mubr.msk.f32.mxu0 %vm682_vm0, %v683_v4 }
   0xd   :  { %p664_p3 = por %p663_p2, %p662_p1 }
   0xf   :  { %566 = vmatmul.mubr.msk.f32.gmra.mrb[4].mxu0 %vm37_vm1, %v23_v10  ;;  %p665_p4 = pnand %p664_p3, %p658_p0 }
  0x10   :  { %568 = vmatprep.mubr.msk.f32.mxu0 %vm682_vm0, %v683_v4 }
  0x13   :  { %569 = vmatmul.mubr.msk.f32.gmra.mrb[6].mxu0 %vm37_vm1, %v24_v11 }
  0x14   :  { %571 = vmatprep.mubr.msk.f32.mxu0 %vm682_vm0, %v683_v4 }
  0x17   :  { %572 = vmatmul.mubr.msk.f32.gmra.mrb[8].mxu0 %vm37_vm1, %v25_v12 }
  0x18   :  { %574 = vmatprep.mubr.msk.f32.mxu0 %vm682_vm0, %v683_v4 }
  0x1b   :  { %575 = vmatmul.mubr.msk.f32.gmra.mrb[10].mxu0 %vm37_vm1, %v26_v13 }
  0x1c   :  { %577 = vmatprep.mubr.msk.f32.mxu0 %vm682_vm0, %v683_v4 }
  0x1f   :  { %578 = vmatmul.mubr.msk.f32.gmra.mrb[12].mxu0 %vm37_vm1, %v27_v14  ;;  %v684_v14 = vmov 4  }
  0x20   :  { %627 = vset.pattern.permute.xlu1 %v684_v14  ;;  %628 = vset.pattern.permute.xlu0 %v684_v14 }
  0xda   :  { %v125_v19 = vpop.f32.mrb[0].mxu0 }
  0xdb   :  { %v126_v20 = vadd.f32 %v519_v18, %v125_v19  ;;  %v561_v21 = vpop.f32.mrb[1].mxu0 }
  0xdd   :  { %v159_v22 = vmax.f32 %v126_v20, 0.0 }
  0xde   :  { %v130_v23 = vpop.f32.mrb[2].mxu0 }
  0xdf   :  { %v131_v24 = vadd.f32 %v519_v18, %v130_v23  ;;  %v564_v25 = vpop.f32.mrb[3].mxu0  ;;  %589 = vmatmul.mubr.msk.f32.vlgmr.msra.gmra.mrb[0].mxu1 %vm177_vm2, %v159_v22 }
  0xe0   :  { %591 = vmatprep.mubr.msk.f32.mxu1 %vm682_vm0, %v683_v4 }
  0xe1   :  { %v160_v26 = vmax.f32 %v131_v24, 0.0 }
  0xe2   :  { %v135_v27 = vpop.f32.mrb[4].mxu0 }
  0xe3   :  { %v136_v28 = vadd.f32 %v519_v18, %v135_v27  ;;  %v567_v29 = vpop.f32.mrb[5].mxu0  ;;  %592 = vmatmul.mubr.msk.f32.gmra.mrb[2].mxu1 %vm177_vm2, %v160_v26 }
  0xe4   :  { %594 = vmatprep.mubr.msk.f32.mxu1 %vm682_vm0, %v683_v4 }
  0xe5   :  { %v161_v30 = vmax.f32 %v136_v28, 0.0 }
  0xe6   :  { %v140_v31 = vpop.f32.mrb[6].mxu0 }
  0xe7   :  { %v141_v32 = vadd.f32 %v519_v18, %v140_v31  ;;  %v570_v33 = vpop.f32.mrb[7].mxu0  ;;  %595 = vmatmul.mubr.msk.f32.gmra.mrb[4].mxu1 %vm177_vm2, %v161_v30 }
  0xe8   :  { %597 = vmatprep.mubr.msk.f32.mxu1 %vm682_vm0, %v683_v4 }
  0xe9   :  { %v162_v34 = vmax.f32 %v141_v32, 0.0 }
  0xea   :  { %v145_v35 = vpop.f32.mrb[8].mxu0 }
  0xeb   :  { %v146_v36 = vadd.f32 %v519_v18, %v145_v35  ;;  %v573_v37 = vpop.f32.mrb[9].mxu0  ;;  %598 = vmatmul.mubr.msk.f32.gmra.mrb[6].mxu1 %vm177_vm2, %v162_v34 }
  0xec   :  { %600 = vmatprep.mubr.msk.f32.mxu1 %vm682_vm0, %v683_v4 }
  0xed   :  { %v163_v38 = vmax.f32 %v146_v36, 0.0 }
  0xee   :  { %v150_v39 = vpop.f32.mrb[10].mxu0 }
  0xef   :  { %v151_v40 = vadd.f32 %v519_v18, %v150_v39  ;;  %v576_v41 = vpop.f32.mrb[11].mxu0  ;;  %601 = vmatmul.mubr.msk.f32.gmra.mrb[8].mxu1 %vm177_vm2, %v163_v38 }
  0xf0   :  { %603 = vmatprep.mubr.msk.f32.mxu1 %vm682_vm0, %v683_v4 }
  0xf1   :  { %v164_v42 = vmax.f32 %v151_v40, 0.0 }
  0xf2   :  { %v155_v43 = vpop.f32.mrb[12].mxu0 }
  0xf3   :  { %v156_v44 = vadd.f32 %v519_v18, %v155_v43  ;;  %v579_v45 = vpop.f32.mrb[13].mxu0  ;;  %604 = vmatmul.mubr.msk.f32.gmra.mrb[10].mxu1 %vm177_vm2, %v164_v42 }
  0xf4   :  { %606 = vmatprep.mubr.msk.f32.mxu1 %vm682_vm0, %v683_v4 }
  0xf5   :  { %v165_v46 = vmax.f32 %v156_v44, 0.0 }
  0xf7   :  { %607 = vmatmul.mubr.msk.f32.gmra.mrb[12].mxu1 %vm177_vm2, %v165_v46 }
 0x1b2   :  { %v265_v50 = vpop.f32.mrb[0].mxu1 }
 0x1b3   :  { %v809_v51 = vadd.f32 %v527_v49, %v265_v50  ;;  %v590_v52 = vpop.f32.mrb[1].mxu1 }
 0x1b5   :  { %v319_v53 = vsel %vm301_vm3, %v809_v51, -inf }
 0x1b6   :  { %326 = vmax.xlane.f32.xlu0 %v319_v53  ;;  %v270_v54 = vpop.f32.mrb[2].mxu1 }
 0x1b7   :  { %v814_v55 = vadd.f32 %v527_v49, %v270_v54  ;;  %v593_v56 = vpop.f32.mrb[3].mxu1 }
 0x1b9   :  { %v320_v57 = vsel %vm301_vm3, %v814_v55, -inf }
 0x1ba   :  { %328 = vmax.xlane.f32.xlu0 %v320_v57  ;;  %v275_v58 = vpop.f32.mrb[4].mxu1 }
 0x1bb   :  { %v819_v59 = vadd.f32 %v527_v49, %v275_v58  ;;  %v596_v60 = vpop.f32.mrb[5].mxu1 }
 0x1bd   :  { %v321_v61 = vsel %vm301_vm3, %v819_v59, -inf }
 0x1be   :  { %330 = vmax.xlane.f32.xlu1 %v321_v61  ;;  %v280_v62 = vpop.f32.mrb[6].mxu1 }
 0x1bf   :  { %v824_v63 = vadd.f32 %v527_v49, %v280_v62  ;;  %v599_v0 = vpop.f32.mrb[7].mxu1 }
 0x1c1   :  { %v322_v1 = vsel %vm301_vm3, %v824_v63, -inf }
 0x1c2   :  { %332 = vmax.xlane.f32.xlu1 %v322_v1  ;;  %v285_v2 = vpop.f32.mrb[8].mxu1 }
 0x1c3   :  { %v829_v3 = vadd.f32 %v527_v49, %v285_v2  ;;  %v602_v4 = vpop.f32.mrb[9].mxu1 }
 0x1c5   :  { %v323_v5 = vsel %vm301_vm3, %v829_v3, -inf }
 0x1c6   :  { %334 = vmax.xlane.f32.xlu0 %v323_v5  ;;  %v290_v6 = vpop.f32.mrb[10].mxu1 }
 0x1c7   :  { %v834_v7 = vadd.f32 %v527_v49, %v290_v6  ;;  %v605_v8 = vpop.f32.mrb[11].mxu1 }
 0x1c9   :  { %v324_v9 = vsel %vm301_vm3, %v834_v7, -inf }
 0x1ca   :  { %336 = vmax.xlane.f32.xlu1 %v324_v9  ;;  %v295_v10 = vpop.f32.mrb[12].mxu1 }
 0x1cb   :  { %v839_v11 = vadd.f32 %v527_v49, %v295_v10  ;;  %v608_v12 = vpop.f32.mrb[13].mxu1 }
 0x1cc   :  { %v303_v12 = vshrl.u32 %v299_v47, 7 }
 0x1cd   :  { %v325_v13 = vsel %vm301_vm3, %v839_v11, -inf }
 0x1ce   :  { %338 = vmax.xlane.f32.xlu0 %v325_v13 }
 0x243   :  { %v327_v15 = vpop.xlane.xlu0 %326 }
 0x244   :  { %v340_v16 = vsub.f32 %v809_v51, %v327_v15 }
 0x246   :  { %v347_v17 = vmul.f32 1.442695, %v340_v16 }
 0x247   :  { %v329_v18 = vpop.xlane.xlu0 %328 }
 0x248   :  { %629 = vpow2.f32 %v347_v17  ;;  %v341_v19 = vsub.f32 %v814_v55, %v329_v18 }
 0x24a   :  { %v349_v20 = vmul.f32 1.442695, %v341_v19 }
 0x24b   :  { %v331_v21 = vpop.xlane.xlu1 %330 }
 0x24c   :  { %631 = vpow2.f32 %v349_v20  ;;  %v342_v22 = vsub.f32 %v819_v59, %v331_v21  ;;  %v309_v20 = vadd.s32 48, %v303_v12 }
 0x24e   :  { %v351_v23 = vmul.f32 1.442695, %v342_v22  ;;  %vm316_vm4 = vcmp.lt.s32.totalorder %v309_v20, 50 }
 0x24f   :  { %v333_v24 = vpop.xlane.xlu1 %332 }
 0x250   :  { %633 = vpow2.f32 %v351_v23  ;;  %v343_v25 = vsub.f32 %v824_v63, %v333_v24 }
 0x252   :  { %v630_v26 = vpop.eup %629  ;;  %v353_v27 = vmul.f32 1.442695, %v343_v25 }
 0x253   :  { %v335_v28 = vpop.xlane.xlu0 %334  ;;  %v361_v29 = vsel %vm301_vm3, %v630_v26, 0.0 }
 0x254   :  { %635 = vpow2.f32 %v353_v27  ;;  %v344_v30 = vsub.f32 %v829_v3, %v335_v28  ;;  %368 = vadd.xlane.f32.xlu1 %v361_v29 }
 0x256   :  { %v632_v31 = vpop.eup %631  ;;  %v355_v32 = vmul.f32 1.442695, %v344_v30 }
 0x257   :  { %v337_v33 = vpop.xlane.xlu1 %336  ;;  %v362_v34 = vsel %vm301_vm3, %v632_v31, 0.0 }
 0x258   :  { %637 = vpow2.f32 %v355_v32  ;;  %v345_v35 = vsub.f32 %v834_v7, %v337_v33  ;;  %370 = vadd.xlane.f32.xlu0 %v362_v34 }
 0x25a   :  { %v634_v36 = vpop.eup %633  ;;  %v357_v37 = vmul.f32 1.442695, %v345_v35 }
 0x25b   :  { %v339_v38 = vpop.xlane.xlu0 %338  ;;  %v363_v39 = vsel %vm301_vm3, %v634_v36, 0.0 }
 0x25c   :  { %639 = vpow2.f32 %v357_v37  ;;  %v346_v40 = vsub.f32 %v839_v11, %v339_v38  ;;  %372 = vadd.xlane.f32.xlu1 %v363_v39 }
 0x25e   :  { %v636_v41 = vpop.eup %635  ;;  %v359_v42 = vmul.f32 1.442695, %v346_v40 }
 0x25f   :  { %v364_v43 = vsel %vm301_vm3, %v636_v41, 0.0 }
 0x260   :  { %641 = vpow2.f32 %v359_v42  ;;  %374 = vadd.xlane.f32.xlu0 %v364_v43 }
 0x262   :  { %v638_v44 = vpop.eup %637 }
 0x263   :  { %v365_v45 = vsel %vm301_vm3, %v638_v44, 0.0 }
 0x264   :  { %376 = vadd.xlane.f32.xlu1 %v365_v45 }
 0x266   :  { %v640_v46 = vpop.eup %639 }
 0x267   :  { %v366_v49 = vsel %vm301_vm3, %v640_v46, 0.0 }
 0x268   :  { %378 = vadd.xlane.f32.xlu0 %v366_v49 }
 0x26a   :  { %v642_v50 = vpop.eup %641 }
 0x26b   :  { %v367_v52 = vsel %vm301_vm3, %v642_v50, 0.0 }
 0x26c   :  { %380 = vadd.xlane.f32.xlu1 %v367_v52 }
 0x27d   :  { %449 = vperm.xlu1 %627, %v809_v51  }
 0x281   :  { %459 = vperm.xlu1 %627, %v819_v59  }
 0x285   :  { %464 = vperm.xlu1 %627, %v824_v63  }
 0x289   :  { %469 = vperm.xlu1 %627, %v829_v3  }
 0x28d   :  { %474 = vperm.xlu1 %627, %v834_v7  }
 0x291   :  { %479 = vperm.xlu1 %627, %v839_v11  }
 0x2e1   :  { %v369_v53 = vpop.xlane.xlu1 %368 }
 0x2e5   :  { %v371_v54 = vpop.xlane.xlu0 %370 }
 0x2e6   :  { %643 = vrcp.f32 %v371_v54 }
 0x2e7   :  { %645 = vrcp.f32 %v369_v53 }
 0x2e9   :  { %v373_v56 = vpop.xlane.xlu1 %372 }
 0x2ea   :  { %647 = vrcp.f32 %v373_v56 }
 0x2ed   :  { %v375_v57 = vpop.xlane.xlu0 %374 }
 0x2ee   :  { %649 = vrcp.f32 %v375_v57 }
 0x2f0   :  { %v644_v60 = vpop.eup %643 }
 0x2f1   :  { %v377_v58 = vpop.xlane.xlu1 %376  ;;  %v646_v62 = vpop.eup %645  ;;  %v385_v1 = vmul.f32 %v644_v60, %v362_v34 }
 0x2f2   :  { %651 = vrcp.f32 %v377_v58  ;;  %v383_v5 = vmul.f32 %v646_v62, %v361_v29 }
 0x2f3   :  { %v397_v10 = vmul.f32 %v385_v1, %v814_v55 }
 0x2f4   :  { %v648_v0 = vpop.eup %647  ;;  %v396_v14 = vmul.f32 %v383_v5, %v809_v51 }
 0x2f5   :  { %v379_v61 = vpop.xlane.xlu0 %378  ;;  %v387_v6 = vmul.f32 %v648_v0, %v363_v39 }
 0x2f6   :  { %653 = vrcp.f32 %v379_v61  ;;  %v424_v18 = vadd.f32 %v397_v10, %v396_v14 }
 0x2f7   :  { %v398_v15 = vmul.f32 %v387_v6, %v819_v59 }
 0x2f8   :  { %v650_v2 = vpop.eup %649 }
 0x2f9   :  { %v381_v4 = vpop.xlane.xlu1 %380  ;;  %v389_v9 = vmul.f32 %v650_v2, %v364_v43  ;;  %v425_v22 = vadd.f32 %v424_v18, %v398_v15 }
 0x2fa   :  { %655 = vrcp.f32 %v381_v4 }
 0x2fb   :  { %v399_v17 = vmul.f32 %v389_v9, %v824_v63 }
 0x2fc   :  { %v652_v8 = vpop.eup %651 }
 0x2fd   :  { %v391_v13 = vmul.f32 %v652_v8, %v365_v45  ;;  %v426_v25 = vadd.f32 %v425_v22, %v399_v17  ;;  %v450_v38 = vpop.permute.xlu1 %449 }
 0x2ff   :  { %v400_v21 = vmul.f32 %v391_v13, %v829_v3 }
 0x300   :  { %v654_v16 = vpop.eup %653 }
 0x301   :  { %v393_v19 = vmul.f32 %v654_v16, %v366_v49  ;;  %v427_v47 = vadd.f32 %v426_v25, %v400_v21  ;;  %v460_v39 = vpop.permute.xlu1 %459 }
 0x303   :  { %v401_v24 = vmul.f32 %v393_v19, %v834_v7 }
 0x304   :  { %v656_v23 = vpop.eup %655 }
 0x305   :  { %v395_v26 = vmul.f32 %v656_v23, %v367_v52  ;;  %v428_v28 = vadd.f32 %v427_v47, %v401_v24  ;;  %v465_v40 = vpop.permute.xlu1 %464 }
 0x307   :  { %v402_v27 = vmul.f32 %v395_v26, %v839_v11 }
 0x309   :  { %v423_v29 = vsel %vm316_vm4, %v402_v27, 0.0  ;;  %v470_v41 = vpop.permute.xlu1 %469 }
 0x30a   :  { %v429_v30 = vadd.f32 %v428_v28, %v423_v29 }
 0x30c   :  { %430 = vadd.xlane.f32.xlu0 %v429_v30 }
 0x30d   :  { %v475_v42 = vpop.permute.xlu1 %474 }
 0x311   :  { %v480_v56 = vpop.permute.xlu1 %479 }
 0x322   :  { %454 = vperm.xlu0 %628, %v814_v55  }
 0x399   :  { %v431_v31 = vpop.xlane.xlu0 %430 }
 0x39a   :  { %v432_v32 = vrot.slane %v431_v31, 4 }
 0x39c   :  { %v433_v33 = vadd.f32 %v432_v32, %v431_v31 }
 0x39e   :  { %v434_v34 = vrot.slane %v433_v33, 2 }
 0x3a0   :  { %v435_v35 = vadd.f32 %v434_v34, %v433_v33 }
 0x3a1   :  { %v455_v50 = vpop.permute.xlu0 %454 }
 0x3a2   :  { %v436_v36 = vrot.slane %v435_v35, 1 }
 0x3a4   :  { %v437_v37 = vadd.f32 %v436_v36, %v435_v35 }
 0x3a6   :  { %618 = vpush %v437_v37 }
 0x3d7   :  { %s619_s3 = spop %618 }
 0x3d8   :  { %v439_v43 = vstv %s619_s3 }
 0x3d9   :  { %v440_v44 = vsub.f32 %v809_v51, %v439_v43  ;;  %v441_v45 = vsub.f32 %v814_v55, %v439_v43  ;;  %v442_v46 = vsub.f32 %v819_v59, %v439_v43  ;;  %v443_v49 = vsub.f32 %v824_v63, %v439_v43 }
 0x3da   :  { %v444_v52 = vsub.f32 %v829_v3, %v439_v43  ;;  %v445_v53 = vsub.f32 %v834_v7, %v439_v43  ;;  %v446_v54 = vsub.f32 %v839_v11, %v439_v43 }
 0x3db   :  { %v482_v57 = vadd.f32 %v450_v38, %v440_v44  ;;  %v483_v58 = vadd.f32 %v455_v50, %v441_v45  ;;  %v484_v60 = vadd.f32 %v460_v39, %v442_v46  ;;  %v485_v51 = vadd.f32 %v465_v40, %v443_v49 }
 0x3dc   :  { %v486_v61 = vadd.f32 %v470_v41, %v444_v52  ;;  %v487_v55 = vadd.f32 %v475_v42, %v445_v53  ;;  %v488_v62 = vadd.f32 %v480_v56, %v446_v54 }
 0x3dd   :  { %v489_v59 = vsel %vm301_vm3, %v482_v57, 0.0  ;;  %v490_v63 = vsel %vm301_vm3, %v483_v58, 0.0  ;;  %v491_v3 = vsel %vm301_vm3, %v484_v60, 0.0  ;;  %v492_v7 = vsel %vm301_vm3, %v485_v51, 0.0 }
 0x3de   :  { %v493_v11 = vsel %vm301_vm3, %v486_v61, 0.0  ;;  %v494_v0 = vsel %vm301_vm3, %v487_v55, 0.0  ;;  %v495_v1 = vsel %vm301_vm3, %v488_v62, 0.0  ;;  %496 = vst [vmem:[#allocation2] sm:$0xff] %v489_v59  ;;  %497 = vst [vmem:[#allocation2 + $0x8] sm:$0xff] %v490_v63 }
 0x3df   :  { %498 = vst [vmem:[#allocation2 + $0x10] sm:$0xff] %v491_v3  ;;  %499 = vst [vmem:[#allocation2 + $0x18] sm:$0xff] %v492_v7 }
 0x3e0   :  { %500 = vst [vmem:[#allocation2 + $0x20] sm:$0xff] %v493_v11  ;;  %501 = vst [vmem:[#allocation2 + $0x28] sm:$0xff] %v494_v0 }
 0x3e1   :  { %502 = vst [vmem:[#allocation2 + $0x30] sm:$0xff] %v495_v1 }
 0x3e2   :  { %668 = shalt.err (!%p665_p4)
}
 0x3e3   :  { %s669_s24 = scalar_lea.hbm %s925_s5, 896 }
 0x3e4   :  { %p670_p5 = scmp.ne.s32.totalorder %s925_s5, %s669_s24  ;;  %p673_p6 = scmp.lt.u32.totalorder %s669_s24, %s925_s5 }
 0x3e6   :  { %p675_p7 = pnand %p673_p6, %p670_p5 }
 0x3e8   :  { %678 = shalt.err (!%p675_p7)
}
 0x3e9   :  { %s686_s28 = smov 128   ;;  %s687_s29 = smov 8  }
 0x3ea   :  { %514 = dma.vmem_to_hbm [thread:$0]  %s887_s20, 896, %s925_s5, [#allocation3], %s686_s28, %s686_s28, %s687_s29  }
 0x3eb   :  { %679 = dma.done.wait [#allocation3], 896  }
 0x3ec   :  { %680 = vsyncadd [#allocation3], 4294966400 }
 0x3ed   :  { %518 = vsyncpa [#allocation3], 1 }

</bundles_post_ra>
